<compile_context>
chip_gen: v7x
topology: tpu7x:2x2x1
jax: 0.10.0
libtpu: 0.0.40
codegen_flags: <defaults>
</compile_context>

<pallas_src>
import functools
import math

import jax
import jax.numpy as jnp
from jax.experimental import pallas as pl
from jax.experimental.pallas import tpu as pltpu


def _decompress_kernel(x_ref, lhs_ref, rhs_ref, o_ref, *, compute_dtype):
    """One block of `bc` images: out_slab = lhs @ ((x @ rhs) re-tiled to (H_in, bc*W_out))."""
    bc, h_in, w_in = x_ref.shape
    h_out = lhs_ref.shape[0]
    w_out = rhs_ref.shape[1]

    lhs = lhs_ref[...].astype(compute_dtype)
    rhs = rhs_ref[...].astype(compute_dtype)

    # Stage 1: one big matmul for the whole block: (bc*H_in, W_in) @ (W_in, W_out).
    x2 = x_ref[...].reshape(bc * h_in, w_in).astype(compute_dtype)
    t = jnp.dot(x2, rhs, preferred_element_type=jnp.float32)        # (bc*H_in, W_out) f32

    # Re-tile so the image index lives in the lane dimension: (H_in, bc*W_out).
    # Each per-image (H_in, W_out) tile is moved from a row-block to a column-block
    # (no transpose needed, just a lane-axis concat).
    t2 = jnp.concatenate(
        [t[b * h_in:(b + 1) * h_in, :] for b in range(bc)], axis=1)  # (H_in, bc*W_out)

    # Stage 2: (H_out, H_in) @ (H_in, bc*W_out) -> lane-dense result, stored as-is.
    o_ref[...] = jnp.dot(lhs, t2.astype(compute_dtype),
                         preferred_element_type=jnp.float32)


def _choose_images_per_block(B, h_in, w_in, h_out, w_out):
    """Images per grid step: output lane width must be a multiple of 128; cap by VMEM."""
    k0 = 128 // math.gcd(w_out, 128)          # min images so per*w_out % 128 == 0
    # Aim for ~512-lane-wide output tiles (diminishing returns beyond a few vregs).
    per = max(k0, -(-512 // w_out))
    per = -(-per // k0) * k0
    # Keep at least 2 grid steps so both v7x TensorCores get work.
    half = -(-max(k0, -(-B // 2)) // k0) * k0
    per = min(per, half)
    # Conservative VMEM guard (v7x: 64 MiB/core total; blocks are double-buffered).
    bytes_per_img = 4 * (h_in * w_in + h_out * w_out + 2 * h_in * w_out)
    max_per = max(k0, ((24 * 1024 * 1024) // (2 * bytes_per_img)) // k0 * k0)
    return max(k0, min(per, max_per))


def compressor_model_forward(x, lhs, rhs, *, compute_dtype=jnp.float32):
    """Pallas implementation of CompressorModel.forward.

    x:   (N, 3, H_in, W_in) float32
    lhs: (H_out, H_in)      float32
    rhs: (W_in, W_out)      float32
    returns (N, 3, H_out, W_out) float32
    """
    n, c, h_in, w_in = x.shape
    h_out, lhs_h_in = lhs.shape
    rhs_w_in, w_out = rhs.shape
    assert lhs_h_in == h_in and rhs_w_in == w_in

    B = n * c
    xb = x.reshape(B, h_in, w_in)

    per = _choose_images_per_block(B, h_in, w_in, h_out, w_out)
    num_blocks = -(-B // per)
    if num_blocks % 2:                 # even parallel grid -> both v7x TensorCores busy
        num_blocks += 1
    b_pad = num_blocks * per
    if b_pad != B:                     # zero-pad the flattened image axis; sliced off below
        xb = jnp.pad(xb, ((0, b_pad - B), (0, 0), (0, 0)))

    flops = 2 * b_pad * (h_in * w_in * w_out + h_out * h_in * w_out)
    bytes_accessed = 4 * (b_pad * h_in * w_in + h_out * h_in + w_in * w_out
                          + h_out * b_pad * w_out)

    kernel = functools.partial(_decompress_kernel, compute_dtype=compute_dtype)

    out_slab = pl.pallas_call(
        kernel,
        out_shape=jax.ShapeDtypeStruct((h_out, b_pad * w_out), jnp.float32),
        grid_spec=pltpu.PrefetchScalarGridSpec(
            num_scalar_prefetch=0,
            grid=(num_blocks,),
            in_specs=[
                # block of `per` images; last two dims are the full (H_in, W_in) extents
                pl.BlockSpec((per, h_in, w_in), lambda i: (i, 0, 0)),
                # grid-invariant operands: constant index_map -> fetched once, reused
                pl.BlockSpec((h_out, h_in), lambda i: (0, 0)),
                pl.BlockSpec((w_in, w_out), lambda i: (0, 0)),
            ],
            # lane-dense output slab: last dim per*W_out is a multiple of 128
            out_specs=pl.BlockSpec((h_out, per * w_out), lambda i: (0, i)),
        ),
        compiler_params=pltpu.CompilerParams(
            dimension_semantics=("parallel",)),
        cost_estimate=pl.CostEstimate(
            flops=flops, transcendentals=0, bytes_accessed=bytes_accessed),
    )(xb, lhs, rhs)

    # Wrapper-side layout plumbing: (H_out, B_pad*W_out) -> (N, C, H_out, W_out).
    out = out_slab.reshape(h_out, b_pad, w_out)[:, :B, :]
    out = out.transpose(1, 0, 2).reshape(n, c, h_out, w_out)
    return out


def _reference(x, lhs, rhs):
    """Pure-JAX reference mirroring the PyTorch forward."""
    return jnp.einsum("oh,nchw,wp->ncop", lhs, x, rhs)


if __name__ == "__main__":
    key = jax.random.PRNGKey(0)
    kx, kl, kr = jax.random.split(key, 3)

    N, C, H_IN, W_IN = 2, 3, 16, 16        # module hard-codes 3 (RGB) channels
    H_OUT, W_OUT = 32, 32

    x = jax.random.normal(kx, (N, C, H_IN, W_IN), dtype=jnp.float32)
    # Deterministic synthetic stand-ins for get_lhs_rhs_decompress(PARAMS).
    lhs = jax.random.normal(kl, (H_OUT, H_IN), dtype=jnp.float32) / jnp.sqrt(H_IN)
    rhs = jax.random.normal(kr, (W_IN, W_OUT), dtype=jnp.float32) / jnp.sqrt(W_IN)

    ref = jax.block_until_ready(_reference(x, lhs, rhs))

    # f32 path (exact semantics of the PyTorch module).
    out = jax.block_until_ready(compressor_model_forward(x, lhs, rhs))
    assert out.shape == (N, C, H_OUT, W_OUT), out.shape
    assert jnp.allclose(out, ref, atol=1e-4, rtol=1e-4), "f32 mismatch vs reference"

    # bf16-operand / f32-accumulate path (v6e/v7x MXU fast path), looser tolerance.
    out_bf16 = jax.block_until_ready(
        compressor_model_forward(x, lhs, rhs, compute_dtype=jnp.bfloat16))
    assert jnp.allclose(out_bf16, ref, atol=5e-2, rtol=5e-2), "bf16 mismatch vs reference"

    print("KERNEL_OK")
</pallas_src>

<mosaic_0001>
module attributes {stable_mosaic.version = 11 : i64} {
  func.func @_decompress_kernel(%arg0: i32, %arg1: memref<4x16x16xf32, #tpu.memory_space<vmem>>, %arg2: memref<32x16xf32, #tpu.memory_space<vmem>>, %arg3: memref<16x32xf32, #tpu.memory_space<vmem>>, %arg4: memref<32x128xf32, #tpu.memory_space<vmem>>) attributes {dimension_semantics = [#tpu.dimension_semantics<parallel>], iteration_bounds = array<i64: 2>, scalar_prefetch = 0 : i64, scratch_operands = 0 : i64, tpu.core_type = #tpu.core_type<tc>, window_params = [{transform_indices = @transform_0, window_bounds = array<i64: 4, 16, 16>}, {pipeline_mode = #tpu.pipeline_mode<synchronous>, transform_indices = @transform_1, window_bounds = array<i64: 32, 16>}, {pipeline_mode = #tpu.pipeline_mode<synchronous>, transform_indices = @transform_2, window_bounds = array<i64: 16, 32>}, {transform_indices = @transform_3, window_bounds = array<i64: 32, 128>}]} {
    %c0 = arith.constant 0 : index
    %c0_0 = arith.constant 0 : index
    %0 = vector.load %arg2[%c0, %c0_0] : memref<32x16xf32, #tpu.memory_space<vmem>>, vector<32x16xf32>
    %c0_1 = arith.constant 0 : index
    %c0_2 = arith.constant 0 : index
    %1 = vector.load %arg3[%c0_1, %c0_2] : memref<16x32xf32, #tpu.memory_space<vmem>>, vector<16x32xf32>
    %c0_3 = arith.constant 0 : index
    %c0_4 = arith.constant 0 : index
    %c0_5 = arith.constant 0 : index
    %2 = vector.load %arg1[%c0_3, %c0_4, %c0_5] : memref<4x16x16xf32, #tpu.memory_space<vmem>>, vector<4x16x16xf32>
    %3 = vector.shape_cast %2 : vector<4x16x16xf32> to vector<64x16xf32>
    %cst = arith.constant dense<0.000000e+00> : vector<64x32xf32>
    %4 = tpu.matmul %3, %1, %cst {dimension_numbers = #tpu.dot_dimension_numbers<[1], [0], [0], [1], [0, 0, 1, 1], [], []>} : vector<64x16xf32>, vector<16x32xf32>, vector<64x32xf32> -> vector<64x32xf32>
    %5 = vector.extract_strided_slice %4 {offsets = [0, 0], sizes = [16, 32], strides = [1, 1]} : vector<64x32xf32> to vector<16x32xf32>
    %6 = vector.extract_strided_slice %4 {offsets = [16, 0], sizes = [16, 32], strides = [1, 1]} : vector<64x32xf32> to vector<16x32xf32>
    %7 = vector.extract_strided_slice %4 {offsets = [32, 0], sizes = [16, 32], strides = [1, 1]} : vector<64x32xf32> to vector<16x32xf32>
    %8 = vector.extract_strided_slice %4 {offsets = [48, 0], sizes = [16, 32], strides = [1, 1]} : vector<64x32xf32> to vector<16x32xf32>
    %9 = tpu.concatenate %5, %6, %7, %8 in 1 : vector<16x32xf32>, vector<16x32xf32>, vector<16x32xf32>, vector<16x32xf32> -> vector<16x128xf32>
    %cst_6 = arith.constant dense<0.000000e+00> : vector<32x128xf32>
    %10 = tpu.matmul %0, %9, %cst_6 {dimension_numbers = #tpu.dot_dimension_numbers<[1], [0], [0], [1], [0, 0, 1, 1], [], []>} : vector<32x16xf32>, vector<16x128xf32>, vector<32x128xf32> -> vector<32x128xf32>
    %c0_7 = arith.constant 0 : index
    %c0_8 = arith.constant 0 : index
    %11 = vector.load %arg4[%c0_7, %c0_8] : memref<32x128xf32, #tpu.memory_space<vmem>>, vector<32x128xf32>
    tpu.vector_store %arg4[%c0_7, %c0_8], %10 {strides = array<i32>} : memref<32x128xf32, #tpu.memory_space<vmem>>, vector<32x128xf32>,
    return
  }
  func.func @transform_0(%arg0: i32) -> (i32, i32, i32) {
    %c0_i32 = arith.constant 0 : i32
    %c0_i32_0 = arith.constant 0 : i32
    %c0_i32_1 = arith.constant 0 : i32
    return %arg0, %c0_i32, %c0_i32_0 : i32, i32, i32
  }
  func.func @transform_1(%arg0: i32) -> (i32, i32) {
    %c0_i32 = arith.constant 0 : i32
    %c0_i32_0 = arith.constant 0 : i32
    %c0_i32_1 = arith.constant 0 : i32
    return %c0_i32, %c0_i32_0 : i32, i32
  }
  func.func @transform_2(%arg0: i32) -> (i32, i32) {
    %c0_i32 = arith.constant 0 : i32
    %c0_i32_0 = arith.constant 0 : i32
    %c0_i32_1 = arith.constant 0 : i32
    return %c0_i32, %c0_i32_0 : i32, i32
  }
  func.func @transform_3(%arg0: i32) -> (i32, i32) {
    %c0_i32 = arith.constant 0 : i32
    %c0_i32_0 = arith.constant 0 : i32
    return %c0_i32, %arg0 : i32, i32
  }
}

</mosaic_0001>

<bundles_post_ra>
// kernel: tpu_custom_call.1
= control target key start
LH: loop header
LB: loop body
LE: loop exit
PB: predicated region body
PF: predicated region fallthrough
CT: control target
= control target key end

     0   :  { %8 = vsyncpa [#allocation3], 0  ;;  %s1025_s0 = inlined_call_operand.hbm [shape: f32[8,16,16], index: 0, kind: input, shape index: {}]   ;;  %s1026_s1 = inlined_call_operand.vmem [shape: f32[32,16], index: 1, kind: input, shape index: {}]   ;;  %s1027_s2 = inlined_call_operand.vmem [shape: f32[16,32], index: 2, kind: input, shape index: {}]   ;;  %s1028_s3 = inlined_call_operand.hbm [shape: f32[32,256], index: 3, kind: output, shape index: {}]  }
   0x1   :  { %10 = vsyncpa [#allocation3 + $0x1], 0 }
   0x2   :  { %11 = vsyncpa [#allocation4], 0 }
   0x3   :  { %13 = vsyncpa [#allocation4 + $0x1], 0  ;;  %s832_s12 = smov 0   ;;  %s834_s13 = smov 0  }
   0x4   :  { %s836_s14 = smov 0   ;;  %s838_s15 = smov 0  }
   0x5 LB: > { %s853_s16 = sadd.s32 4294967295, %s800_s15   ;;  %s555_s17 = sadd.s32 4294967294, %s800_s15   ;;  %s800_s15 = sphi %s838_s15, %s1041_s15   ;;  %s796_s14 = sphi %s836_s14, %s1040_s14   ;;  %s792_s13 = sphi %s834_s13, %s1039_s13   ;;  %s788_s12 = sphi %s832_s12, %s1038_s12  }
   0x6   : > { %s857_s18 = sadd.s32 1, %s800_s15   ;;  %s26_s19 = sadd.s32 1, %s796_s14 }
   0x7   : > { %s23_s20 = ssub.s32 %s800_s15, %s857_s18  ;;  %p33_p0 = scmp.ne.s32.totalorder %s796_s14, %s792_s13 }
   0x8   : > { %p24_p1 = scmp.eq.s32.totalorder %s23_s20, 0  ;;  %p34_p2 = scmp.eq.s32.totalorder %s800_s15, 0 }
   0x9   : > { %p39_p3 = scmp.ne.s32.totalorder %s792_s13, %s788_s12  ;;  %p40_p4 = scmp.eq.s32.totalorder %s853_s16, 0 }
   0xa   : > { %s869_s21 = scalar_select %p24_p1, %s796_s14, %s26_s19  }
   0xb   : > { %p871_p5 = por %p34_p2, %p33_p0  ;;  %p875_p6 = por %p40_p4, %p39_p3 }
   0xc   : > { %p105_p7 = scmp.eq.s32.totalorder %s853_s16, 1  ;;  %p111_p8 = scmp.eq.s32.totalorder %s555_s17, 1 }
   0xd   : > { %p647_p10 = scmp.lt.s32.totalorder %s800_s15, 2  ;;  %s137_s26 = sand.u32 1, %s796_s14  }
   0xe   : > { %p882_p11 = por %p105_p7, %p33_p0  ;;  %p886_p12 = por %p111_p8, %p39_p3 }
   0xf   : > { %s582_s27 = sshll.u32 %s800_s15, 10  ;;  %s558_s28 = sshll.u32 %s137_s26, 6 }
  0x10   : > { %s1032_s24 = scalar_select %p882_p11, 1, 0 }
  0x11   : > { %s1033_s25 = scalar_select %p886_p12, 1, 0 }
  0x12   : > { %s895_s4 = scalar_lea.hbm %s1025_s0, %s582_s27  ;;  %s141_s5 = scalar_lea.vmem [#allocation2], %s558_s28 }
  0x13   : > { %s149_s6 = sshll.u32 %s141_s5, 4  ;;  %p899_p13 = pnand %p647_p10, %p871_p5  ;;  %s903_s6 = int_to_ptr.vmem [resolvable:$true] %s149_s6 }
  0x14   : > { %s905_s8 = scalar_lea.sflag [#allocation3], %s137_s26  ;;  %s704_s9 = scalar_lea.hbm %s895_s4, 1024 }
  0x15   : > { %p705_p0 = scmp.ne.s32.totalorder %s895_s4, %s704_s9  ;;  %p706_p1 = pneg %p899_p13 }
  0x16   : > { %s709_s17 = scalar_lea.hbm %s1025_s0, 2048  ;;  %p710_p4 = scmp.lt.u32.totalorder %s895_s4, %s1025_s0 }
  0x17   : > { %p707_p2 = pnand %p706_p1, %p705_p0  ;;  %p711_p5 = scmp.lt.u32.totalorder %s709_s17, %s704_s9 }
  0x18   : > { %p713_p8 = scmp.lt.u32.totalorder %s704_s9, %s895_s4 }
  0x19   : > { %p708_p3 = pneg %p707_p2  ;;  %p712_p7 = por %p711_p5, %p710_p4 }
  0x1b   : > { %p714_p10 = por %p713_p8, %p712_p7 }
  0x1d   : > { %p715_p9 = pnand %p714_p10, %p708_p3 }
  0x1f   : > { %718 = shalt.err (!%p715_p9)
}
  0x20   : > { %s719_s22 = scalar_lea.vmem %s903_s6, 1024  ;;  %s802_s26 = smov [#allocation2]  }
  0x21   : > { %p720_p0 = scmp.ne.s32.totalorder %s903_s6, %s719_s22  ;;  %s724_s27 = sshll.u32 %s802_s26, 4  ;;  %s725_s27 = int_to_ptr.vmem [resolvable:$false] %s724_s27 }
  0x22   : > { %s726_s28 = scalar_lea.vmem %s725_s27, 2048  ;;  %p727_p11 = scmp.lt.s32.totalorder %s903_s6, %s725_s27 }
  0x23   : > { %p722_p2 = pnand %p720_p0, %p706_p1  ;;  %p728_p4 = scmp.lt.s32.totalorder %s726_s28, %s719_s22 }
  0x25   : > { %p723_p12 = pneg %p722_p2  ;;  %p729_p5 = por %p728_p4, %p727_p11 }
  0x27   : > { %p730_p7 = pnand %p729_p5, %p723_p12 }
  0x29   : > { %733 = shalt.err (!%p730_p7)
}
  0x2a   : > { %s803_s29 = smov 128   ;;  %s804_s30 = smov 8  }
  0x2b   : > { %642 = dma.hbm_to_vmem [thread:$0]  (!%p899_p13), %s895_s4, 1024, %s903_s6, %s905_s8, %s803_s29, %s803_s29, %s804_s30  }
  0x2c   : > { %p562_p9 = scmp.ge.s32.totalorder %s800_s15, 1  ;;  %p157_p1 = scmp.lt.s32.totalorder %s800_s15, 3 }
  0x2e   : > { %p158_p3 = pnand %p562_p9, %p157_p1 }
  0x2f   : > { %s936_s5 = sand.u32 (!%p158_p3), 1, %s792_s13  }
  0x30   : > { %161 = sbr.rel (%p158_p3) target bundleno = 644 (0x284), region = 32  ;;  %s563_s9 = sshll.u32 (!%p158_p3), %s936_s5, 6 }
  0x31   : > { %s164_s10 = scalar_lea.sflag (!%p158_p3), [#allocation3], %s936_s5  ;;  %s167_s11 = scalar_lea.vmem (!%p158_p3), [#allocation2], %s563_s9 }
  0x37   : > { %779 = dma.done.wait (%p875_p6), %s164_s10, 1024  }
  0x38   : > { %781 = vsyncadd (%p875_p6), %s164_s10, 4294966272  ;;  %vm205_vm0 = vcmask 130048   ;;  %v195_v0 = vld [vmem:[%s1027_s2] sm:$0xff]  ;;  %v196_v1 = vld [vmem:[%s1027_s2 + $0x8] sm:$0xff]  ;;  %s805_s23 = smov 96   ;;  %s806_s20 = smov 32  }
  0x39   : > { %v197_v2 = vld [vmem:[%s167_s11] sm:$0xff]  ;;  %v625_v3 = vpack.c.bf16 %v196_v1, %v195_v0  ;;  %v203_v4 = vld [vmem:[%s167_s11 + $0x30] sm:$0xff]  ;;  %v198_v5 = vld [vmem:[%s167_s11 + $0x8] sm:$0xff]  ;;  %s807_s22 = smov 64   ;;  %vm359_vm1 = vcmask 261120   ;;  %vm362_vm2 = vcmask 523264  }
  0x3a   : > { %603 = vmatprep.mubr.msk.f32.mxu0 %vm205_vm0, %v197_v2  ;;  %v204_v6 = vld [vmem:[%s167_s11 + $0x38] sm:$0xff]  ;;  %v199_v7 = vld [vmem:[%s167_s11 + $0x10] sm:$0xff]  ;;  %612 = vmatprep.mubr.msk.f32.mxu1 %vm205_vm0, %v203_v4  ;;  %v201_v9 = vld [vmem:[%s167_s11 + $0x20] sm:$0xff]  ;;  %vm365_vm3 = vcmask 785408   ;;  %s564_s10 = sshll.u32 %s936_s5, 5  ;;  %s578_s6 = sshll.u32 %s853_s16, 7 }
  0x3b   : > { %626 = vmatprep.subr.bf16.mxu0 %v625_v3  ;;  %633 = vmatprep.subr.bf16.mxu1 %v625_v3  ;;  %v200_v8 = vld [vmem:[%s167_s11 + $0x18] sm:$0xff]  ;;  %v202_v10 = vld [vmem:[%s167_s11 + $0x28] sm:$0xff]  ;;  %v191_v19 = vld [vmem:[%s1026_s1] sm:$0xff]  ;;  %s189_s11 = scalar_lea.vmem [#allocation5], %s564_s10  ;;  %s470_s17 = scalar_lea.sflag [#allocation4], %s936_s5 }
  0x3c   : > { %628 = vmatpush3.bf16.msra.mxu0 %v625_v3  ;;  %634 = vmatpush3.bf16.msra.mxu1 %v625_v3  ;;  %v192_v39 = vld [vmem:[%s1026_s1 + $0x8] sm:$0xff]  ;;  %v193_v40 = vld [vmem:[%s1026_s1 + $0x10] sm:$0xff]  ;;  %v194_v41 = vld [vmem:[%s1026_s1 + $0x18] sm:$0xff]  ;;  %s482_s4 = sshll.u32 %s189_s11, 4  ;;  %p1035_p11 = scmp.ne.s32.totalorder %s1032_s24, 0  ;;  %s976_s4 = int_to_ptr.vmem [resolvable:$true] %s482_s4 }
  0x3d   : > { %s734_s19 = scalar_lea.vmem %s976_s4, 512  ;;  %s808_s16 = smov [#allocation5]  }
  0x3e   : > { %p735_p6 = scmp.ne.s32.totalorder %s976_s4, %s734_s19 }
  0x3f   : > { %604 = vmatmul.mubr.msk.f32.vlgmr.msra.gmra.mrb[0].mxu0 %vm205_vm0, %v198_v5  ;;  %613 = vmatmul.mubr.msk.f32.vlgmr.msra.gmra.mrb[0].mxu1 %vm205_vm0, %v204_v6 }
  0x40   : > { %606 = vmatprep.mubr.msk.f32.mxu0 %vm205_vm0, %v199_v7  ;;  %619 = vmatprep.mubr.msk.f32.mxu1 %vm205_vm0, %v191_v19  ;;  %p736_p12 = pnand %p735_p6, %p1035_p11 }
  0x42   : > { %p737_p13 = pneg %p736_p12 }
  0x43   : > { %607 = vmatmul.mubr.msk.f32.gmra.mrb[2].mxu0 %vm205_vm0, %v200_v8 }
  0x44   : > { %609 = vmatprep.mubr.msk.f32.mxu0 %vm205_vm0, %v201_v9 }
  0x47   : > { %610 = vmatmul.mubr.msk.f32.gmra.mrb[4].mxu0 %vm205_vm0, %v202_v10 }
 0x112   : > { %v605_v11 = vpop.f32.mrb[0].mxu0  ;;  %v614_v12 = vpop.f32.mrb[0].mxu1 }
 0x113   : > { %v296_v13 = vpop.f32.mrb[1].mxu0  ;;  %v326_v14 = vpop.f32.mrb[1].mxu1 }
 0x114   : > { %v699_v15 = vpack.i.bf16 %v614_v12, %v326_v14 }
 0x116   : > { %v608_v16 = vpop.f32.mrb[2].mxu0  ;;  %700 = vrot.lane.b32.xlu1 %v699_v15, %s805_s23  ;;  %s981_s23 = scalar_lea.hbm %s1028_s3, %s578_s6 }
 0x117   : > { %v306_v17 = vpop.f32.mrb[3].mxu0 }
 0x118   : > { %v689_v18 = vpack.i.bf16 %v608_v16, %v306_v17 }
 0x11a   : > { %690 = vrot.lane.b32.xlu0 %v689_v18, %s806_s20  ;;  %v611_v20 = vpop.f32.mrb[4].mxu0  ;;  %s738_s20 = sshll.u32 %s808_s16, 4  ;;  %s739_s20 = int_to_ptr.vmem [resolvable:$false] %s738_s20 }
 0x11b   : > { %v316_v21 = vpop.f32.mrb[5].mxu0  ;;  %p741_p8 = scmp.lt.s32.totalorder %s976_s4, %s739_s20 }
 0x11c   : > { %v694_v22 = vpack.i.bf16 %v611_v20, %v316_v21 }
 0x11e   : > { %695 = vrot.lane.b32.xlu0 %v694_v22, %s807_s22  ;;  %s740_s22 = scalar_lea.vmem %s739_s20, 1024 }
 0x11f   : > { %p742_p10 = scmp.lt.s32.totalorder %s740_s22, %s734_s19 }
 0x121   : > { %p743_p0 = por %p742_p10, %p741_p8 }
 0x123   : > { %p744_p2 = pnand %p743_p0, %p737_p13 }
 0x188   : > { %v701_v24 = vpop.permute.xlu1 %700 }
 0x189   : > { %v703_v27 = vunpack.i.h.bf16 %v701_v24  ;;  %v702_v28 = vunpack.i.l.bf16 %v701_v24 }
 0x18c   : > { %v691_v23 = vpop.permute.xlu0 %690 }
 0x18d   : > { %v693_v25 = vunpack.i.h.bf16 %v691_v23  ;;  %v692_v26 = vunpack.i.l.bf16 %v691_v23 }
 0x18f   : > { %v361_v32 = vsel %vm359_vm1, %v605_v11, %v693_v25  ;;  %v360_v33 = vsel %vm359_vm1, %v296_v13, %v692_v26 }
 0x190   : > { %v696_v29 = vpop.permute.xlu0 %695 }
 0x191   : > { %v698_v30 = vunpack.i.h.bf16 %v696_v29  ;;  %v697_v31 = vunpack.i.l.bf16 %v696_v29 }
 0x193   : > { %v364_v34 = vsel %vm362_vm2, %v361_v32, %v698_v30  ;;  %v363_v35 = vsel %vm362_vm2, %v360_v33, %v697_v31 }
 0x194   : > { %v366_v36 = vsel %vm365_vm3, %v363_v35, %v702_v28  ;;  %v367_v37 = vsel %vm365_vm3, %v364_v34, %v703_v27 }
 0x195   : > { %v629_v38 = vpack.c.bf16 %v367_v37, %v366_v36 }
 0x197   : > { %630 = vmatprep.subr.bf16.mxu1 %v629_v38 }
 0x198   : > { %632 = vmatpush3.bf16.msra.mxu1 %v629_v38 }
 0x19b   : > { %620 = vmatmul.mubr.msk.f32.vlgmr.msra.gmra.mrb[2].mxu1 %vm205_vm0, %v192_v39 }
 0x19c   : > { %622 = vmatprep.mubr.msk.f32.mxu1 %vm205_vm0, %v193_v40 }
 0x19f   : > { %623 = vmatmul.mubr.msk.f32.gmra.mrb[4].mxu1 %vm205_vm0, %v194_v41 }
 0x26e   : > { %v621_v42 = vpop.f32.mrb[2].mxu1 }
 0x26f   : > { %466 = vst [vmem:[%s189_s11 + $0x8] sm:$0xff] %v621_v42  ;;  %v446_v43 = vpop.f32.mrb[3].mxu1 }
 0x270   : > { %465 = vst [vmem:[%s189_s11] sm:$0xff] %v446_v43 }
 0x272   : > { %v624_v44 = vpop.f32.mrb[4].mxu1 }
 0x273   : > { %468 = vst [vmem:[%s189_s11 + $0x18] sm:$0xff] %v624_v44  ;;  %v456_v45 = vpop.f32.mrb[5].mxu1 }
 0x274   : > { %467 = vst [vmem:[%s189_s11 + $0x10] sm:$0xff] %v456_v45 }
 0x275   : > { %747 = shalt.err (!%p744_p2)
}
 0x276   : > { %s748_s26 = scalar_lea.hbm %s981_s23, 512  ;;  %s752_s29 = scalar_lea.hbm %s1028_s3, 1024 }
 0x277   : > { %p749_p4 = scmp.ne.s32.totalorder %s981_s23, %s748_s26  ;;  %p753_p9 = scmp.lt.u32.totalorder %s981_s23, %s1028_s3 }
 0x278   : > { %p754_p1 = scmp.lt.u32.totalorder %s752_s29, %s748_s26  ;;  %p756_p6 = scmp.lt.u32.totalorder %s748_s26, %s981_s23 }
 0x279   : > { %p750_p5 = pnand %p749_p4, %p1035_p11 }
 0x27a   : > { %p755_p3 = por %p754_p1, %p753_p9 }
 0x27b   : > { %p751_p7 = pneg %p750_p5 }
 0x27c   : > { %p757_p12 = por %p756_p6, %p755_p3 }
 0x27e   : > { %p758_p13 = pnand %p757_p12, %p751_p7 }
 0x280   : > { %761 = shalt.err (!%p758_p13)
}
 0x281   : > { %s809_s10 = smov 128   ;;  %s810_s11 = smov 256  }
 0x282   : > { %s811_s6 = smov 8  }
 0x283   : > { %637 = dma.vmem_to_hbm [thread:$0]  (%p1035_p11), %s976_s4, 512, %s981_s23, %s470_s17, %s809_s10, %s810_s11, %s811_s6  }
 0x284 PF: > { %s497_s7 = sand.u32 1, %s788_s12   ;;  %p1036_p8 = scmp.ne.s32.totalorder %s1033_s25, 0 }
 0x285   : > { %p1037_p10 = scmp.ge.s32.totalorder %s800_s15, 2  ;;  %s498_s8 = scalar_lea.sflag [#allocation4], %s497_s7 }
 0x287   : > { %p644_p0 = pnand %p1037_p10, %p1036_p8 }
 0x289   : > { %783 = dma.done.wait (!%p644_p0), %s498_s8, 512  }
 0x28a   : > { %785 = vsyncadd (!%p644_p0), %s498_s8, 4294966784  ;;  %p16_p2 = scmp.ge.s32.totalorder %s857_s18, 4   ;;  %s1038_s12 = smov %s792_s13 }
 0x28b   : > { %s1039_s13 = smov %s796_s14  ;;  %s1040_s14 = smov %s869_s21 }
 0x28c   : > { %s1041_s15 = smov %s857_s18  ;;  %18 = sbr.rel (!%p16_p2) target bundleno = 5 (0x5), region = 77 }
 0x293   :  { %503 = vsyncpa [#allocation3], 1 }
 0x294   :  { %505 = vsyncpa [#allocation3 + $0x1], 1 }
 0x295   :  { %506 = vsyncpa [#allocation4], 1 }
 0x296   :  { %508 = vsyncpa [#allocation4 + $0x1], 1 }

</bundles_post_ra>
